<compile_context>
chip_gen: v7x
topology: tpu7x:2x2x1
jax: 0.10.0
libtpu: 0.0.40
codegen_flags: <defaults>
</compile_context>

<pallas_src>
import functools

import jax
import jax.numpy as jnp
from jax.experimental import pallas as pl
from jax.experimental.pallas import tpu as pltpu


def _round_up(a: int, b: int) -> int:
    return ((a + b - 1) // b) * b


# ---------------------------------------------------------------------------
# Kernel 1: tiled sum-of-squares over the (zero-padded) weight, finalized to
#   scale = g / ||V||_F  in the last grid step.
# Output block index is (0,0) at every grid step => resident (1,1) accumulator.
# ---------------------------------------------------------------------------
def _scale_kernel(g_ref, v_ref, o_ref):
    i = pl.program_id(0)
    j = pl.program_id(1)

    @pl.when((i == 0) & (j == 0))
    def _():
        o_ref[...] = jnp.zeros_like(o_ref)

    blk = v_ref[...].astype(jnp.float32)
    o_ref[...] += jnp.sum(blk * blk).reshape(1, 1)

    @pl.when((i == pl.num_programs(0) - 1) & (j == pl.num_programs(1) - 1))
    def _():
        # scale = g * rsqrt(sum(V^2)) -- rsqrt uses the (otherwise idle) EUP.
        o_ref[...] = g_ref[0, 0] * jax.lax.rsqrt(o_ref[...])


# ---------------------------------------------------------------------------
# Kernel 2: tiled matmul + weight-norm scale + bias + ReLU.
#   o[i,j] = relu(scale * sum_k x[i,k] . v[j,k] + b[j])
# The f32 output block itself is the accumulator (resident across the K axis).
# scale = g / ||V||_F lives in SMEM as a (1,1) scalar.
# ---------------------------------------------------------------------------
def _linear_wn_relu_kernel(scale_ref, x_ref, v_ref, b_ref, o_ref):
    k = pl.program_id(2)

    @pl.when(k == 0)
    def _():
        o_ref[...] = jnp.zeros_like(o_ref)

    # x tile: (tm, tk); v tile: (tn, tk); contract last dims -> (tm, tn).
    # V stays in its PyTorch (out_dim, in_dim) layout; no HBM transpose pass.
    o_ref[...] += jax.lax.dot_general(
        x_ref[...],
        v_ref[...],
        dimension_numbers=(((1,), (1,)), ((), ())),
        preferred_element_type=jnp.float32,
    )

    @pl.when(k == pl.num_programs(2) - 1)
    def _():
        y = o_ref[...] * scale_ref[0, 0] + b_ref[...].astype(jnp.float32)
        o_ref[...] = jnp.maximum(y, 0.0)


# ---------------------------------------------------------------------------
# Wrapper
# ---------------------------------------------------------------------------
@functools.partial(jax.jit, static_argnames=("tm", "tn", "tk"))
def relu_weight_norm_fc(x, v, g, b, *, tm=256, tn=512, tk=1024):
    """x: (..., in_dim), v: (out_dim, in_dim), g: scalar, b: (out_dim,)."""
    f32 = jnp.float32
    lead_shape = x.shape[:-1]
    K = x.shape[-1]
    x2 = x.reshape(-1, K)
    M = x2.shape[0]
    N, K2 = v.shape
    assert K == K2

    # Clamp tiles to the (8,128)-aligned problem size; keep MXU-friendly
    # multiples (tm % 8 == 0, tn % 128 == 0, tk % 128 == 0).
    tm = min(tm, _round_up(M, 8))
    tn = min(tn, _round_up(N, 128))
    tk = min(tk, _round_up(K, 128))
    Mp, Np, Kp = _round_up(M, tm), _round_up(N, tn), _round_up(K, tk)

    xp = x2 if (Mp == M and Kp == K) else jnp.pad(x2, ((0, Mp - M), (0, Kp - K)))
    vp = v if (Np == N and Kp == K) else jnp.pad(v, ((0, Np - N), (0, Kp - K)))
    bp = (b if Np == N else jnp.pad(b, (0, Np - N))).reshape(1, Np)
    g2 = jnp.asarray(g, dtype=f32).reshape(1, 1)

    vmem_limit = 32 * 1024 * 1024  # safe on v5e/v6e/v7x; tiles << limit 2x-buffered

    # scale = g / ||V||_F via a tiled, HBM-streaming Pallas reduction
    # (zero padding does not change the sum of squares).
    scale = pl.pallas_call(
        _scale_kernel,
        out_shape=jax.ShapeDtypeStruct((1, 1), f32),
        grid=(Np // tn, Kp // tk),
        in_specs=[
            pl.BlockSpec((1, 1), lambda i, j: (0, 0),
                         memory_space=pltpu.MemorySpace.SMEM),    # g
            pl.BlockSpec((tn, tk), lambda i, j: (i, j)),           # V tile
        ],
        out_specs=pl.BlockSpec((1, 1), lambda i, j: (0, 0)),
        compiler_params=pltpu.CompilerParams(
            dimension_semantics=("arbitrary", "arbitrary"),
            vmem_limit_bytes=vmem_limit,
        ),
    )(g2, vp)

    grid = (Mp // tm, Np // tn, Kp // tk)
    flops = 2 * Mp * Np * Kp
    bytes_accessed = (
        xp.size * xp.dtype.itemsize
        + vp.size * vp.dtype.itemsize
        + bp.size * bp.dtype.itemsize
        + Mp * Np * 4
    )

    out = pl.pallas_call(
        _linear_wn_relu_kernel,
        out_shape=jax.ShapeDtypeStruct((Mp, Np), f32),
        grid=grid,
        in_specs=[
            pl.BlockSpec((1, 1), lambda i, j, k: (0, 0),
                         memory_space=pltpu.MemorySpace.SMEM),    # scale
            pl.BlockSpec((tm, tk), lambda i, j, k: (i, k)),        # x
            pl.BlockSpec((tn, tk), lambda i, j, k: (j, k)),        # V (native layout)
            pl.BlockSpec((1, tn), lambda i, j, k: (0, j)),         # bias row
        ],
        out_specs=pl.BlockSpec((tm, tn), lambda i, j, k: (i, j)),
        compiler_params=pltpu.CompilerParams(
            # i/j parallel => shards across the 2 TCs on v7x when >= 2 blocks;
            # K is the resident-accumulator reduction axis.
            dimension_semantics=("parallel", "parallel", "arbitrary"),
            vmem_limit_bytes=vmem_limit,
        ),
        cost_estimate=pl.CostEstimate(
            flops=flops, transcendentals=0, bytes_accessed=bytes_accessed),
    )(scale, xp, vp, bp)

    out = out[:M, :N]
    if out.dtype != x.dtype:
        out = out.astype(x.dtype)
    return out.reshape(lead_shape + (N,))


if __name__ == "__main__":
    # Small shapes implied by nn.Linear(in_dim, out_dim): x is (batch, in_dim).
    # Deliberately non-(8,128)-aligned to exercise the padding path.
    batch, in_dim, out_dim = 16, 96, 80

    key = jax.random.PRNGKey(0)
    kx, kv, kg, kb = jax.random.split(key, 4)

    x = jax.random.normal(kx, (batch, in_dim), dtype=jnp.float32)
    # PyTorch Linear weight layout (out_dim, in_dim); deterministic synthetic init.
    v = jax.random.normal(kv, (out_dim, in_dim), dtype=jnp.float32) * 0.05
    g = jax.random.normal(kg, (), dtype=jnp.float32) + 2.0   # scalar g (dim=None)
    b = jax.random.normal(kb, (out_dim,), dtype=jnp.float32) * 0.1

    out = relu_weight_norm_fc(x, v, g, b)
    out = jax.block_until_ready(out)

    # Reference check (plain JAX) of weight_norm(dim=None) + Linear + ReLU.
    w = g * v / jnp.linalg.norm(v)
    ref = jnp.maximum(x @ w.T + b, 0.0)
    assert out.shape == (batch, out_dim)
    assert jnp.allclose(out, ref, atol=1e-4, rtol=1e-4)

    print("KERNEL_OK")
</pallas_src>

<mosaic_0001>
module attributes {stable_mosaic.version = 11 : i64} {
  func.func @_scale_kernel(%arg0: i32, %arg1: i32, %arg2: memref<1x1xf32, #tpu.memory_space<smem>>, %arg3: memref<128x128xf32, #tpu.memory_space<vmem>>, %arg4: memref<1x1xf32, #tpu.memory_space<vmem>>) attributes {dimension_semantics = [#tpu.dimension_semantics<arbitrary>, #tpu.dimension_semantics<arbitrary>], iteration_bounds = array<i64: 1, 1>, scalar_prefetch = 0 : i64, scratch_operands = 0 : i64, tpu.core_type = #tpu.core_type<tc>, window_params = [{transform_indices = @transform_0, window_bounds = array<i64: 1, 1>}, {transform_indices = @transform_1, window_bounds = array<i64: 128, 128>}, {pipeline_mode = #tpu.pipeline_mode<synchronous>, transform_indices = @transform_2, window_bounds = array<i64: 1, 1>}]} {
    %c0_i32 = arith.constant 0 : i32
    %0 = arith.cmpi eq, %arg0, %c0_i32 : i32
    %c0_i32_0 = arith.constant 0 : i32
    %1 = arith.cmpi eq, %arg1, %c0_i32_0 : i32
    %2 = arith.andi %0, %1 : i1
    %3 = arith.extui %2 : i1 to i32
    %c0_i32_1 = arith.constant 0 : i32
    %4 = arith.cmpi ne, %3, %c0_i32_1 : i32
    scf.if %4 {
      %cst_10 = arith.constant 0.000000e+00 : f32
      %20 = vector.broadcast %cst_10 : f32 to vector<1x1xf32>
      %c0_11 = arith.constant 0 : index
      %c0_12 = arith.constant 0 : index
      %21 = vector.load %arg4[%c0_11, %c0_12] : memref<1x1xf32, #tpu.memory_space<vmem>>, vector<1x1xf32>
      tpu.vector_store %arg4[%c0_11, %c0_12], %20 {strides = array<i32>} : memref<1x1xf32, #tpu.memory_space<vmem>>, vector<1x1xf32>,
    } else {
    }
    %c0 = arith.constant 0 : index
    %c0_2 = arith.constant 0 : index
    %5 = vector.load %arg3[%c0, %c0_2] : memref<128x128xf32, #tpu.memory_space<vmem>>, vector<128x128xf32>
    %c0_3 = arith.constant 0 : index
    %c0_4 = arith.constant 0 : index
    %6 = vector.load %arg4[%c0_3, %c0_4] : memref<1x1xf32, #tpu.memory_space<vmem>>, vector<1x1xf32>
    %7 = arith.mulf %5, %5 : vector<128x128xf32>
    %8 = vector.shape_cast %7 : vector<128x128xf32> to vector<1x128x128xf32>
    %cst = arith.constant dense<0.000000e+00> : vector<1xf32>
    %9 = vector.multi_reduction <add>, %8, %cst [1, 2] : vector<1x128x128xf32> to vector<1xf32>
    %10 = vector.shape_cast %9 : vector<1xf32> to vector<1x1x1xf32>
    %11 = vector.extract %10[0, 0, 0] : f32 from vector<1x1x1xf32>
    %12 = vector.broadcast %11 : f32 to vector<1x1xf32>
    %13 = arith.addf %6, %12 : vector<1x1xf32>
    %c0_5 = arith.constant 0 : index
    %c0_6 = arith.constant 0 : index
    %14 = vector.load %arg4[%c0_5, %c0_6] : memref<1x1xf32, #tpu.memory_space<vmem>>, vector<1x1xf32>
    tpu.vector_store %arg4[%c0_5, %c0_6], %13 {strides = array<i32>} : memref<1x1xf32, #tpu.memory_space<vmem>>, vector<1x1xf32>,
    %c0_i32_7 = arith.constant 0 : i32
    %15 = arith.cmpi eq, %arg0, %c0_i32_7 : i32
    %c0_i32_8 = arith.constant 0 : i32
    %16 = arith.cmpi eq, %arg1, %c0_i32_8 : i32
    %17 = arith.andi %15, %16 : i1
    %18 = arith.extui %17 : i1 to i32
    %c0_i32_9 = arith.constant 0 : i32
    %19 = arith.cmpi ne, %18, %c0_i32_9 : i32
    scf.if %19 {
      %c0_10 = arith.constant 0 : index
      %c0_11 = arith.constant 0 : index
      %20 = memref.load %arg2[%c0_10, %c0_11] : memref<1x1xf32, #tpu.memory_space<smem>>
      %c0_12 = arith.constant 0 : index
      %c0_13 = arith.constant 0 : index
      %21 = vector.load %arg4[%c0_12, %c0_13] : memref<1x1xf32, #tpu.memory_space<vmem>>, vector<1x1xf32>
      %22 = math.rsqrt %21 : vector<1x1xf32>
      %23 = vector.broadcast %20 : f32 to vector<1x1xf32>
      %24 = arith.mulf %23, %22 : vector<1x1xf32>
      %c0_14 = arith.constant 0 : index
      %c0_15 = arith.constant 0 : index
      %25 = vector.load %arg4[%c0_14, %c0_15] : memref<1x1xf32, #tpu.memory_space<vmem>>, vector<1x1xf32>
      tpu.vector_store %arg4[%c0_14, %c0_15], %24 {strides = array<i32>} : memref<1x1xf32, #tpu.memory_space<vmem>>, vector<1x1xf32>,
    } else {
    }
    return
  }
  func.func @transform_0(%arg0: i32, %arg1: i32) -> (i32, i32) {
    %c0_i32 = arith.constant 0 : i32
    %c0_i32_0 = arith.constant 0 : i32
    %c0_i32_1 = arith.constant 0 : i32
    return %c0_i32, %c0_i32_0 : i32, i32
  }
  func.func @transform_1(%arg0: i32, %arg1: i32) -> (i32, i32) {
    %c0_i32 = arith.constant 0 : i32
    return %arg0, %arg1 : i32, i32
  }
  func.func @transform_2(%arg0: i32, %arg1: i32) -> (i32, i32) {
    %c0_i32 = arith.constant 0 : i32
    %c0_i32_0 = arith.constant 0 : i32
    %c0_i32_1 = arith.constant 0 : i32
    return %c0_i32, %c0_i32_0 : i32, i32
  }
}

module attributes {stable_mosaic.version = 11 : i64} {
  func.func @_linear_wn_relu_kernel(%arg0: i32, %arg1: i32, %arg2: i32, %arg3: memref<1x1xf32, #tpu.memory_space<smem>>, %arg4: memref<16x128xf32, #tpu.memory_space<vmem>>, %arg5: memref<128x128xf32, #tpu.memory_space<vmem>>, %arg6: memref<1x128xf32, #tpu.memory_space<vmem>>, %arg7: memref<16x128xf32, #tpu.memory_space<vmem>>) attributes {dimension_semantics = [#tpu.dimension_semantics<parallel>, #tpu.dimension_semantics<parallel>, #tpu.dimension_semantics<arbitrary>], iteration_bounds = array<i64: 1, 1, 1>, scalar_prefetch = 0 : i64, scratch_operands = 0 : i64, tpu.core_type = #tpu.core_type<tc>, window_params = [{transform_indices = @transform_0, window_bounds = array<i64: 1, 1>}, {transform_indices = @transform_1, window_bounds = array<i64: 16, 128>}, {transform_indices = @transform_2, window_bounds = array<i64: 128, 128>}, {transform_indices = @transform_3, window_bounds = array<i64: 1, 128>}, {transform_indices = @transform_4, window_bounds = array<i64: 16, 128>}]} {
    %c0_i32 = arith.constant 0 : i32
    %0 = arith.cmpi eq, %arg2, %c0_i32 : i32
    %1 = arith.extui %0 : i1 to i32
    %c0_i32_0 = arith.constant 0 : i32
    %2 = arith.cmpi ne, %1, %c0_i32_0 : i32
    scf.if %2 {
      %cst_10 = arith.constant 0.000000e+00 : f32
      %12 = vector.broadcast %cst_10 : f32 to vector<16x128xf32>
      %c0_11 = arith.constant 0 : index
      %c0_12 = arith.constant 0 : index
      %13 = vector.load %arg7[%c0_11, %c0_12] : memref<16x128xf32, #tpu.memory_space<vmem>>, vector<16x128xf32>
      tpu.vector_store %arg7[%c0_11, %c0_12], %12 {strides = array<i32>} : memref<16x128xf32, #tpu.memory_space<vmem>>, vector<16x128xf32>,
    } else {
    }
    %c0 = arith.constant 0 : index
    %c0_1 = arith.constant 0 : index
    %3 = vector.load %arg7[%c0, %c0_1] : memref<16x128xf32, #tpu.memory_space<vmem>>, vector<16x128xf32>
    %c0_2 = arith.constant 0 : index
    %c0_3 = arith.constant 0 : index
    %4 = vector.load %arg4[%c0_2, %c0_3] : memref<16x128xf32, #tpu.memory_space<vmem>>, vector<16x128xf32>
    %c0_4 = arith.constant 0 : index
    %c0_5 = arith.constant 0 : index
    %5 = vector.load %arg5[%c0_4, %c0_5] : memref<128x128xf32, #tpu.memory_space<vmem>>, vector<128x128xf32>
    %cst = arith.constant dense<0.000000e+00> : vector<16x128xf32>
    %6 = tpu.matmul %4, %5, %cst {dimension_numbers = #tpu.dot_dimension_numbers<[1], [1], [0], [0], [0, 0, 1, 0], [], []>} : vector<16x128xf32>, vector<128x128xf32>, vector<16x128xf32> -> vector<16x128xf32>
    %7 = arith.addf %3, %6 : vector<16x128xf32>
    %c0_6 = arith.constant 0 : index
    %c0_7 = arith.constant 0 : index
    %8 = vector.load %arg7[%c0_6, %c0_7] : memref<16x128xf32, #tpu.memory_space<vmem>>, vector<16x128xf32>
    tpu.vector_store %arg7[%c0_6, %c0_7], %7 {strides = array<i32>} : memref<16x128xf32, #tpu.memory_space<vmem>>, vector<16x128xf32>,
    %c0_i32_8 = arith.constant 0 : i32
    %9 = arith.cmpi eq, %arg2, %c0_i32_8 : i32
    %10 = arith.extui %9 : i1 to i32
    %c0_i32_9 = arith.constant 0 : i32
    %11 = arith.cmpi ne, %10, %c0_i32_9 : i32
    scf.if %11 {
      %c0_10 = arith.constant 0 : index
      %c0_11 = arith.constant 0 : index
      %12 = vector.load %arg7[%c0_10, %c0_11] : memref<16x128xf32, #tpu.memory_space<vmem>>, vector<16x128xf32>
      %c0_12 = arith.constant 0 : index
      %c0_13 = arith.constant 0 : index
      %13 = memref.load %arg3[%c0_12, %c0_13] : memref<1x1xf32, #tpu.memory_space<smem>>
      %14 = vector.broadcast %13 : f32 to vector<16x128xf32>
      %15 = arith.mulf %12, %14 : vector<16x128xf32>
      %c0_14 = arith.constant 0 : index
      %c0_15 = arith.constant 0 : index
      %16 = vector.load %arg6[%c0_14, %c0_15] : memref<1x128xf32, #tpu.memory_space<vmem>>, vector<1x128xf32>
      %17 = vector.broadcast %16 : vector<1x128xf32> to vector<16x128xf32>
      %18 = arith.addf %15, %17 : vector<16x128xf32>
      %cst_16 = arith.constant 0.000000e+00 : f32
      %19 = vector.broadcast %cst_16 : f32 to vector<16x128xf32>
      %20 = arith.maximumf %18, %19 : vector<16x128xf32>
      %c0_17 = arith.constant 0 : index
      %c0_18 = arith.constant 0 : index
      %21 = vector.load %arg7[%c0_17, %c0_18] : memref<16x128xf32, #tpu.memory_space<vmem>>, vector<16x128xf32>
      tpu.vector_store %arg7[%c0_17, %c0_18], %20 {strides = array<i32>} : memref<16x128xf32, #tpu.memory_space<vmem>>, vector<16x128xf32>,
    } else {
    }
    return
  }
  func.func @transform_0(%arg0: i32, %arg1: i32, %arg2: i32) -> (i32, i32) {
    %c0_i32 = arith.constant 0 : i32
    %c0_i32_0 = arith.constant 0 : i32
    %c0_i32_1 = arith.constant 0 : i32
    return %c0_i32, %c0_i32_0 : i32, i32
  }
  func.func @transform_1(%arg0: i32, %arg1: i32, %arg2: i32) -> (i32, i32) {
    %c0_i32 = arith.constant 0 : i32
    return %arg0, %arg2 : i32, i32
  }
  func.func @transform_2(%arg0: i32, %arg1: i32, %arg2: i32) -> (i32, i32) {
    %c0_i32 = arith.constant 0 : i32
    return %arg1, %arg2 : i32, i32
  }
  func.func @transform_3(%arg0: i32, %arg1: i32, %arg2: i32) -> (i32, i32) {
    %c0_i32 = arith.constant 0 : i32
    %c0_i32_0 = arith.constant 0 : i32
    return %c0_i32, %arg1 : i32, i32
  }
  func.func @transform_4(%arg0: i32, %arg1: i32, %arg2: i32) -> (i32, i32) {
    %c0_i32 = arith.constant 0 : i32
    return %arg0, %arg1 : i32, i32
  }
}

</mosaic_0001>

<bundles_post_ra>
// kernel: relu_weight_norm_fc.2
= control target key start
LH: loop header
LB: loop body
LE: loop exit
PB: predicated region body
PF: predicated region fallthrough
CT: control target
= control target key end

     0   :  { %s217_s0 = inlined_call_operand.<no memory space> [shape: f32[1,1], index: 0, kind: input, shape index: {}]   ;;  %s218_s1 = inlined_call_operand.vmem [shape: f32[128,128], index: 1, kind: input, shape index: {}]   ;;  %s219_s2 = inlined_call_operand.hbm [shape: f32[1,1], index: 2, kind: output, shape index: {}]  }
   0x1   :  { %v21_v0 = vld [vmem:[%s218_s1] sm:$0xff]  ;;  %v22_v1 = vld [vmem:[%s218_s1 + $0x8] sm:$0xff]  ;;  %v23_v2 = vld [vmem:[%s218_s1 + $0x10] sm:$0xff] }
   0x2   :  { %v24_v3 = vld [vmem:[%s218_s1 + $0x18] sm:$0xff]  ;;  %v38_v4 = vmul.f32 %v21_v0, %v21_v0  ;;  %v39_v5 = vmul.f32 %v22_v1, %v22_v1  ;;  %v40_v6 = vmul.f32 %v23_v2, %v23_v2  ;;  %v25_v7 = vld [vmem:[%s218_s1 + $0x20] sm:$0xff]  ;;  %v26_v10 = vld [vmem:[%s218_s1 + $0x28] sm:$0xff] }
   0x3   :  { %v41_v8 = vmul.f32 %v24_v3, %v24_v3  ;;  %v42_v11 = vmul.f32 %v25_v7, %v25_v7 }
   0x4   :  { %v54_v9 = vadd.f32 %v39_v5, %v38_v4 }
   0x6   :  { %v55_v12 = vadd.f32 %v54_v9, %v40_v6 }
   0x7   :  { %8 = vsyncpa [#allocation4], 0  ;;  %v27_v13 = vld [vmem:[%s218_s1 + $0x30] sm:$0xff]  ;;  %v43_v14 = vmul.f32 %v26_v10, %v26_v10  ;;  %v28_v16 = vld [vmem:[%s218_s1 + $0x38] sm:$0xff]  ;;  %vm19_vm0 = vcmask 0   ;;  %v134_v47 = vmov 0.0   ;;  %v87_v59 = vstv %s217_s0 }
   0x8   :  { %v56_v15 = vadd.f32 %v55_v12, %v41_v8  ;;  %v44_v17 = vmul.f32 %v27_v13, %v27_v13  ;;  %v29_v19 = vld [vmem:[%s218_s1 + $0x40] sm:$0xff]  ;;  %v45_v20 = vmul.f32 %v28_v16, %v28_v16  ;;  %v30_v22 = vld [vmem:[%s218_s1 + $0x48] sm:$0xff]  ;;  %v31_v25 = vld [vmem:[%s218_s1 + $0x50] sm:$0xff]  ;;  %20 = vst.msk [vmem:[#allocation3] sm:$0x1] %vm19_vm0, %v134_v47  ;;  %s135_s15 = smov [#allocation3]  }
   0x9   :  { %v46_v23 = vmul.f32 %v29_v19, %v29_v19  ;;  %v47_v26 = vmul.f32 %v30_v22, %v30_v22  ;;  %v32_v28 = vld [vmem:[%s218_s1 + $0x58] sm:$0xff]  ;;  %v48_v29 = vmul.f32 %v31_v25, %v31_v25  ;;  %v33_v31 = vld [vmem:[%s218_s1 + $0x60] sm:$0xff]  ;;  %v34_v34 = vld [vmem:[%s218_s1 + $0x68] sm:$0xff]  ;;  %s96_s16 = sshll.u32 %s135_s15, 4  ;;  %s97_s16 = int_to_ptr.vmem [resolvable:$true] %s96_s16 }
   0xa   :  { %v57_v18 = vadd.f32 %v56_v15, %v42_v11  ;;  %v49_v32 = vmul.f32 %v32_v28, %v32_v28  ;;  %v50_v35 = vmul.f32 %v33_v31, %v33_v31  ;;  %v35_v37 = vld [vmem:[%s218_s1 + $0x70] sm:$0xff]  ;;  %v51_v38 = vmul.f32 %v34_v34, %v34_v34  ;;  %v36_v40 = vld [vmem:[%s218_s1 + $0x78] sm:$0xff]  ;;  %s110_s17 = scalar_lea.vmem %s97_s16, 16  ;;  %s114_s18 = scalar_lea.vmem %s97_s16, 32 }
   0xb   :  { %v52_v41 = vmul.f32 %v35_v37, %v35_v37  ;;  %v53_v43 = vmul.f32 %v36_v40, %v36_v40  ;;  %p111_p0 = scmp.ne.s32.totalorder %s97_s16, %s110_s17  ;;  %p115_p1 = scmp.lt.s32.totalorder %s97_s16, %s97_s16 }
   0xc   :  { %v58_v21 = vadd.f32 %v57_v18, %v43_v14  ;;  %p116_p2 = scmp.lt.s32.totalorder %s114_s18, %s110_s17 }
   0xe   :  { %v59_v24 = vadd.f32 %v58_v21, %v44_v17  ;;  %p117_p3 = por %p116_p2, %p115_p1 }
   0xf   :  { %v37_v55 = vld [vmem:[#allocation3] sm:$0x1] }
  0x10   :  { %v60_v27 = vadd.f32 %v59_v24, %v45_v20  ;;  %p118_p4 = pnand %p117_p3, %p111_p0 }
  0x12   :  { %v61_v30 = vadd.f32 %v60_v27, %v46_v23 }
  0x14   :  { %v62_v33 = vadd.f32 %v61_v30, %v47_v26 }
  0x16   :  { %v63_v36 = vadd.f32 %v62_v33, %v48_v29 }
  0x18   :  { %v64_v39 = vadd.f32 %v63_v36, %v49_v32 }
  0x1a   :  { %v65_v42 = vadd.f32 %v64_v39, %v50_v35 }
  0x1c   :  { %v66_v44 = vadd.f32 %v65_v42, %v51_v38 }
  0x1e   :  { %v67_v45 = vadd.f32 %v66_v44, %v52_v41 }
  0x20   :  { %v68_v46 = vadd.f32 %v67_v45, %v53_v43 }
  0x22   :  { %69 = vadd.xlane.f32.xlu0 %v68_v46 }
  0xaf   :  { %v70_v48 = vpop.xlane.xlu0 %69 }
  0xb0   :  { %v71_v49 = vrot.slane %v70_v48, 4 }
  0xb2   :  { %v72_v50 = vadd.f32 %v71_v49, %v70_v48 }
  0xb4   :  { %v73_v51 = vrot.slane %v72_v50, 2 }
  0xb6   :  { %v74_v52 = vadd.f32 %v73_v51, %v72_v50 }
  0xb8   :  { %v75_v53 = vrot.slane %v74_v52, 1 }
  0xba   :  { %v76_v54 = vadd.f32 %v75_v53, %v74_v52 }
  0xbc   :  { %104 = vpush %v76_v54 }
  0xed   :  { %s105_s1 = spop %104 }
  0xee   :  { %v78_v56 = vstv %s105_s1 }
  0xef   :  { %v79_v57 = vadd.f32 %v78_v56, %v37_v55 }
  0xf1   :  { %81 = vst.msk [vmem:[#allocation3] sm:$0x1] %vm19_vm0, %v79_v57 }
  0xf8   :  { %v85_v58 = vld [vmem:[#allocation3] sm:$0x1] }
  0xf9   :  { %108 = vrsqrt.f32 %v85_v58 }
 0x103   :  { %v109_v60 = vpop.eup %108 }
 0x104   :  { %v88_v61 = vmul.f32 %v109_v60, %v87_v59 }
 0x106   :  { %89 = vst.msk [vmem:[#allocation3] sm:$0x1] %vm19_vm0, %v88_v61 }
 0x107   :  { %121 = shalt.err (!%p118_p4)
}
 0x108   :  { %s122_s21 = scalar_lea.hbm %s219_s2, 16 }
 0x109   :  { %p123_p5 = scmp.ne.s32.totalorder %s219_s2, %s122_s21  ;;  %p126_p6 = scmp.lt.u32.totalorder %s122_s21, %s219_s2 }
 0x10b   :  { %p128_p7 = pnand %p126_p6, %p123_p5 }
 0x10d   :  { %131 = shalt.err (!%p128_p7)
}
 0x10e   :  { %99 = dma.vmem_to_hbm [thread:$0]  %s97_s16, 16, %s219_s2, [#allocation4]  }
 0x10f   :  { %132 = dma.done.wait [#allocation4], 16  }
 0x110   :  { %133 = vsyncadd [#allocation4], 4294967280 }
 0x111   :  { %103 = vsyncpa [#allocation4], 1 }

// kernel: relu_weight_norm_fc.3
= control target key start
LH: loop header
LB: loop body
LE: loop exit
PB: predicated region body
PF: predicated region fallthrough
CT: control target
= control target key end

     0   :  { %s376_s0 = inlined_call_operand.<no memory space> [shape: f32[1,1], index: 0, kind: input, shape index: {}]   ;;  %s377_s1 = inlined_call_operand.vmem [shape: f32[16,128], index: 1, kind: input, shape index: {}]   ;;  %s378_s2 = inlined_call_operand.vmem [shape: f32[128,128], index: 2, kind: input, shape index: {}]   ;;  %s379_s3 = inlined_call_operand.vmem [shape: f32[1,128], index: 3, kind: input, shape index: {}]   ;;  %s380_s4 = inlined_call_operand.hbm [shape: f32[16,128], index: 4, kind: output, shape index: {}]  }
   0x1   :  { %v29_v0 = vld [vmem:[%s378_s2] sm:$0xff]  ;;  %v30_v1 = vld [vmem:[%s378_s2 + $0x8] sm:$0xff]  ;;  %v31_v2 = vld [vmem:[%s378_s2 + $0x10] sm:$0xff] }
   0x2   :  { %v216_v3 = vpack.c.bf16 %v30_v1, %v29_v0  ;;  %v32_v4 = vld [vmem:[%s378_s2 + $0x18] sm:$0xff]  ;;  %v27_v6 = vld [vmem:[%s377_s1] sm:$0xff]  ;;  %v34_v8 = vld [vmem:[%s378_s2 + $0x28] sm:$0xff] }
   0x3   :  { %v220_v5 = vpack.c.bf16 %v32_v4, %v31_v2  ;;  %v33_v7 = vld [vmem:[%s378_s2 + $0x20] sm:$0xff]  ;;  %213 = vmatprep.mubr.f32.mxu0 %v27_v6 }
   0x4   :  { %217 = vmatprep.subr.bf16.mxu0 %v216_v3 }
   0x5   :  { %219 = vmatpush3.bf16.xpose.msra.mxu0 %v216_v3 }
   0x6   :  { %221 = vmatprep.subr.bf16.mxu0 %v220_v5 }
   0x7   :  { %10 = vsyncpa [#allocation4], 0  ;;  %v224_v9 = vpack.c.bf16 %v34_v8, %v33_v7  ;;  %v35_v10 = vld [vmem:[%s378_s2 + $0x30] sm:$0xff]  ;;  %v36_v11 = vld [vmem:[%s378_s2 + $0x38] sm:$0xff]  ;;  %v130_v27 = vstv %s376_s0 }
   0x8   :  { %v228_v12 = vpack.c.bf16 %v36_v11, %v35_v10  ;;  %v37_v13 = vld [vmem:[%s378_s2 + $0x40] sm:$0xff]  ;;  %v38_v14 = vld [vmem:[%s378_s2 + $0x48] sm:$0xff]  ;;  %v39_v16 = vld [vmem:[%s378_s2 + $0x50] sm:$0xff] }
   0x9   :  { %v232_v15 = vpack.c.bf16 %v38_v14, %v37_v13  ;;  %v40_v17 = vld [vmem:[%s378_s2 + $0x58] sm:$0xff]  ;;  %v41_v19 = vld [vmem:[%s378_s2 + $0x60] sm:$0xff]  ;;  %v42_v20 = vld [vmem:[%s378_s2 + $0x68] sm:$0xff] }
   0xa   :  { %v236_v18 = vpack.c.bf16 %v40_v17, %v39_v16  ;;  %v240_v21 = vpack.c.bf16 %v42_v20, %v41_v19  ;;  %v43_v22 = vld [vmem:[%s378_s2 + $0x70] sm:$0xff]  ;;  %v44_v23 = vld [vmem:[%s378_s2 + $0x78] sm:$0xff]  ;;  %v28_v25 = vld [vmem:[%s377_s1 + $0x8] sm:$0xff]  ;;  %s276_s2 = smov [#allocation3]  }
   0xb   :  { %v244_v24 = vpack.c.bf16 %v44_v23, %v43_v22  ;;  %v162_v29 = vld [vmem:[%s379_s3] ss:$0 sm:$0xff]  ;;  %s151_s29 = sshll.u32 %s276_s2, 4  ;;  %s152_s29 = int_to_ptr.vmem [resolvable:$true] %s151_s29 }
   0xc   :  { %s252_s1 = scalar_lea.vmem %s152_s29, 256  ;;  %p257_p1 = scmp.lt.s32.totalorder %s152_s29, %s152_s29 }
   0xd   :  { %223 = vmatpush3.bf16.xpose.msra.mxu0 %v220_v5  ;;  %p253_p0 = scmp.ne.s32.totalorder %s152_s29, %s252_s1  ;;  %p258_p2 = scmp.lt.s32.totalorder %s252_s1, %s252_s1 }
   0xe   :  { %225 = vmatprep.subr.bf16.mxu0 %v224_v9 }
   0xf   :  { %p259_p3 = por %p258_p2, %p257_p1 }
  0x11   :  { %p260_p4 = pnand %p259_p3, %p253_p0 }
  0x15   :  { %227 = vmatpush3.bf16.xpose.msra.mxu0 %v224_v9 }
  0x16   :  { %229 = vmatprep.subr.bf16.mxu0 %v228_v12 }
  0x1d   :  { %231 = vmatpush3.bf16.xpose.msra.mxu0 %v228_v12 }
  0x1e   :  { %233 = vmatprep.subr.bf16.mxu0 %v232_v15 }
  0x25   :  { %235 = vmatpush3.bf16.xpose.msra.mxu0 %v232_v15 }
  0x26   :  { %237 = vmatprep.subr.bf16.mxu0 %v236_v18 }
  0x2d   :  { %239 = vmatpush3.bf16.xpose.msra.mxu0 %v236_v18 }
  0x2e   :  { %241 = vmatprep.subr.bf16.mxu0 %v240_v21 }
  0x35   :  { %243 = vmatpush3.bf16.xpose.msra.mxu0 %v240_v21 }
  0x36   :  { %245 = vmatprep.subr.bf16.mxu0 %v244_v24 }
  0x3d   :  { %247 = vmatpush3.bf16.xpose.msra.mxu0 %v244_v24 }
  0x44   :  { %214 = vmatmul.mubr.f32.vlgmr.msra.gmra.mrb[0].mxu0 %v28_v25 }
 0x117   :  { %v215_v26 = vpop.f32.mrb[0].mxu0 }
 0x118   :  { %v111_v28 = vpop.f32.mrb[1].mxu0  ;;  %v132_v30 = vmul.f32 %v215_v26, %v130_v27 }
 0x119   :  { %v131_v31 = vmul.f32 %v130_v27, %v111_v28 }
 0x11a   :  { %v141_v32 = vadd.f32 %v162_v29, %v132_v30 }
 0x11b   :  { %v140_v33 = vadd.f32 %v162_v29, %v131_v31 }
 0x11c   :  { %v143_v34 = vmax.f32 %v141_v32, 0.0 }
 0x11d   :  { %v142_v35 = vmax.f32 %v140_v33, 0.0 }
 0x11e   :  { %145 = vst [vmem:[#allocation3 + $0x8] sm:$0xff] %v143_v34 }
 0x11f   :  { %144 = vst [vmem:[#allocation3] sm:$0xff] %v142_v35 }
 0x120   :  { %263 = shalt.err (!%p260_p4)
}
 0x121   :  { %s264_s30 = scalar_lea.hbm %s380_s4, 256 }
 0x122   :  { %p265_p5 = scmp.ne.s32.totalorder %s380_s4, %s264_s30  ;;  %p268_p6 = scmp.lt.u32.totalorder %s264_s30, %s380_s4 }
 0x124   :  { %p270_p7 = pnand %p268_p6, %p265_p5 }
 0x126   :  { %273 = shalt.err (!%p270_p7)
}
 0x127   :  { %s277_s9 = smov 128   ;;  %s278_s10 = smov 8  }
 0x128   :  { %157 = dma.vmem_to_hbm [thread:$0]  %s152_s29, 256, %s380_s4, [#allocation4], %s277_s9, %s277_s9, %s278_s10  }
 0x129   :  { %274 = dma.done.wait [#allocation4], 256  }
 0x12a   :  { %275 = vsyncadd [#allocation4], 4294967040 }
 0x12b   :  { %161 = vsyncpa [#allocation4], 1 }

</bundles_post_ra>
